<compile_context>
chip_gen: v5e
topology: v5e:2x2
jax: 0.10.0
libtpu: 0.0.40
codegen_flags: <defaults>
</compile_context>

<pallas_src>
import functools

import jax
import jax.numpy as jnp
from jax.experimental import pallas as pl
from jax.experimental.pallas import tpu as pltpu


# ------------------------------ kernel body ---------------------------------

def _defunc_kernel(y_ref, w1_ref, b1_ref, w2_ref, b2_ref, w3_ref, b3_ref,
                   o_ref, *, mxu_dtype, split_w2):
    """Fused 3-layer MLP: tanh(tanh(y@W1+b1)@W2+b2)@W3+b3.

    Operands arrive pre-folded into a lane-dense layout (feature axes are
    multiples of 128 whenever latent_dim divides 128), so matmuls and the
    output store are unmasked.  MXU operands are mxu_dtype (bf16 by default);
    accumulation, bias add and tanh are f32.  The backwards negation is folded
    into (pre-negated) W3/b3 by the wrapper, so there is no sign pass here.
    """
    x = y_ref[...].astype(mxu_dtype)
    h = jnp.dot(x, w1_ref[...], preferred_element_type=jnp.float32) + b1_ref[...]
    h = jnp.tanh(h).astype(mxu_dtype)
    if split_w2:
        # Block-diagonal W2/W3 with folded hidden width == 256: the two
        # off-diagonal 128x128 quadrants of W2 are exactly zero, so on a
        # 128x128-MXU chip (v5e) two half-lane dots halve the layer-2 MXU
        # tiles.  All slices are 128-lane aligned (vreg aligned).
        h_lo = jnp.dot(h[:, :128], w2_ref[:128, :128],
                       preferred_element_type=jnp.float32)
        h_hi = jnp.dot(h[:, 128:], w2_ref[128:, 128:],
                       preferred_element_type=jnp.float32)
        g_lo = jnp.tanh(h_lo + b2_ref[:, :128]).astype(mxu_dtype)
        g_hi = jnp.tanh(h_hi + b2_ref[:, 128:]).astype(mxu_dtype)
        out = (jnp.dot(g_lo, w3_ref[:128, :], preferred_element_type=jnp.float32)
               + jnp.dot(g_hi, w3_ref[128:, :], preferred_element_type=jnp.float32)
               + b3_ref[...])
    else:
        h = jnp.dot(h, w2_ref[...], preferred_element_type=jnp.float32) + b2_ref[...]
        h = jnp.tanh(h).astype(mxu_dtype)
        out = jnp.dot(h, w3_ref[...], preferred_element_type=jnp.float32) + b3_ref[...]
    o_ref[...] = out.astype(o_ref.dtype)


# ------------------------------ helpers -------------------------------------

def _round_up(x, m):
    return (x + m - 1) // m * m


def _fold_factor(latent_dim):
    """How many batch rows to fold into one 128-lane row (1 = no fold)."""
    if 0 < latent_dim < 128 and 128 % latent_dim == 0:
        return 128 // latent_dim
    return 1


def _block_diag(w, f):
    """Host-side (prepare-time) block-diagonal expansion of a weight matrix."""
    if f == 1:
        return jnp.asarray(w)
    din, dout = w.shape
    out = jnp.zeros((f * din, f * dout), w.dtype)
    for i in range(f):
        out = out.at[i * din:(i + 1) * din, i * dout:(i + 1) * dout].set(w)
    return out


def _mxu_is_128x128():
    """True on chips with a 128x128 MXU (v2-v5); False on v6e/v7x (256x256)."""
    try:
        kind = jax.devices()[0].device_kind.lower()
    except Exception:
        return False
    return any(v in kind for v in ("v2", "v3", "v4", "v5"))


def _vmem_cap_bytes():
    """Physical VMEM minus margin (v7x has only 64 MiB; v5e/v6e have 128)."""
    try:
        phys = int(pltpu.get_tpu_info().vmem_capacity_bytes)
    except Exception:
        phys = 64 << 20            # conservative v7x assumption
    return max(phys - (16 << 20), 32 << 20)


def _choose_folded_tile(folded_batch, folded_row_bytes):
    """Rows (in folded-row units) per grid step.

    One block if everything fits ~1 MiB; otherwise ~512 KiB blocks, >=4 steps,
    sublane dim a multiple of 8, and an even step count when cheap (balanced
    work for v7x's two TensorCores; extra steps also hide first-fetch /
    last-writeback on v5e's slow HBM)."""
    if folded_batch <= 8:
        return folded_batch
    cap = max(8, ((1 << 20) // max(1, folded_row_bytes)) // 8 * 8)
    if folded_batch <= cap:
        return folded_batch                       # single ~<=1 MiB block
    target = max(8, ((512 << 10) // max(1, folded_row_bytes)) // 8 * 8)
    tile = min(target, _round_up(-(-folded_batch // 4), 8), cap)
    tile = max(8, (tile // 8) * 8)
    steps = -(-folded_batch // tile)
    if steps % 2 and tile > 8:
        base_total = _round_up(folded_batch, tile)
        for cand in range(tile - 8, 7, -8):
            if (-(-folded_batch // cand)) % 2 == 0 and \
                    _round_up(folded_batch, cand) <= base_total + tile // 2:
                tile = cand
                break
    return tile


def prepare_defunc_params(params, mxu_dtype=jnp.bfloat16):
    """Fold MLP weights into the lane-dense block-diagonal layout (do once).

    Weights are stored in mxu_dtype (bf16 by default: native MXU rate, half the
    per-call HBM bytes); biases stay f32.  A pre-negated W3/b3 copy is stored
    so the backwards pass reuses the same compiled kernel with no sign pass.
    """
    w1, b1, w2, b2, w3, b3 = [jnp.asarray(p) for p in params]
    D, H = w1.shape
    assert w2.shape == (H, H) and w3.shape == (H, D), (w1.shape, w2.shape, w3.shape)
    f = _fold_factor(D)
    mxu_dtype = jnp.dtype(mxu_dtype)
    split_w2 = bool(f > 1 and f * H == 256 and 128 % H == 0 and _mxu_is_128x128())

    def fold_w(w):
        return _block_diag(w, f).astype(mxu_dtype)

    def fold_b(b):
        return jnp.tile(jnp.asarray(b, jnp.float32).reshape(1, -1), (1, f))

    w3f, b3f = fold_w(w3), fold_b(b3)
    return {
        "w1": fold_w(w1), "b1": fold_b(b1),
        "w2": fold_w(w2), "b2": fold_b(b2),
        "w3": w3f, "b3": b3f,
        "w3_neg": -w3f, "b3_neg": -b3f,
        "latent_dim": int(D), "hidden_dim": int(H), "fold": int(f),
        "mxu_dtype": mxu_dtype, "split_w2": split_w2,
    }


def _defunc_apply(y_current, prep, *, backwards, batch_tile):
    D = prep["latent_dim"]
    assert y_current.shape[-1] == D, (y_current.shape, D)
    lead_shape = y_current.shape[:-1]
    y2 = y_current.reshape(-1, D)
    B = y2.shape[0]

    f = prep["fold"]
    H = prep["hidden_dim"]
    mxu_dtype = prep["mxu_dtype"]
    out_dtype = y_current.dtype
    Df, Hf = f * D, f * H

    in_itemsize = jnp.dtype(y2.dtype).itemsize
    out_itemsize = jnp.dtype(out_dtype).itemsize

    Bf = -(-B // f)                                  # folded rows (ceil)
    if batch_tile is not None:
        tile_f = max(1, int(batch_tile) // max(1, f))
        if tile_f < Bf and tile_f % 8:
            tile_f = max(8, (tile_f // 8) * 8)
    else:
        tile_f = _choose_folded_tile(Bf, Df * in_itemsize)
    if tile_f >= Bf:
        tile_f = Bf                                  # single full-array block

    rows_f_total = _round_up(Bf, tile_f)             # folded rows incl. padding
    rows_total = rows_f_total * f                    # original rows incl. padding
    # Single pad (if any) straight to the final padded size; the fold itself is
    # a row-major reshape, so it moves no data.
    y2p = y2 if rows_total == B else jnp.pad(y2, ((0, rows_total - B), (0, 0)))
    y_fold = y2p.reshape(rows_f_total, Df)
    grid = (rows_f_total // tile_f,)

    # backwards sign lives in the pre-negated weight copy (static selection).
    w3 = prep["w3_neg"] if backwards else prep["w3"]
    b3 = prep["b3_neg"] if backwards else prep["b3"]

    w_bytes = sum(int(prep[k].size) * jnp.dtype(prep[k].dtype).itemsize
                  for k in ("w1", "b1", "w2", "b2", "w3", "b3"))
    cost = pl.CostEstimate(
        flops=2 * rows_f_total * (Df * Hf + Hf * Hf + Hf * Df),
        transcendentals=2 * rows_f_total * Hf,
        bytes_accessed=rows_f_total * Df * (in_itemsize + out_itemsize) + w_bytes,
    )
    tile_bytes = tile_f * Df * (in_itemsize + out_itemsize)
    needed = 2 * tile_bytes + 2 * w_bytes + (8 << 20)
    vmem_limit = int(min(max(needed, 32 << 20), _vmem_cap_bytes()))

    kernel = functools.partial(_defunc_kernel, mxu_dtype=mxu_dtype,
                               split_w2=prep["split_w2"])

    out_f = pl.pallas_call(
        kernel,
        out_shape=jax.ShapeDtypeStruct((rows_f_total, Df), out_dtype),
        grid_spec=pltpu.PrefetchScalarGridSpec(
            num_scalar_prefetch=0,
            grid=grid,
            in_specs=[
                pl.BlockSpec((tile_f, Df), lambda i: (i, 0)),   # y (folded)
                pl.BlockSpec((Df, Hf), lambda i: (0, 0)),       # W1 (block-diag)
                pl.BlockSpec((1, Hf), lambda i: (0, 0)),        # b1
                pl.BlockSpec((Hf, Hf), lambda i: (0, 0)),       # W2
                pl.BlockSpec((1, Hf), lambda i: (0, 0)),        # b2
                pl.BlockSpec((Hf, Df), lambda i: (0, 0)),       # W3 (sign folded)
                pl.BlockSpec((1, Df), lambda i: (0, 0)),        # b3 (sign folded)
            ],
            out_specs=pl.BlockSpec((tile_f, Df), lambda i: (i, 0)),
        ),
        compiler_params=pltpu.CompilerParams(
            dimension_semantics=("parallel",),
            vmem_limit_bytes=vmem_limit,
        ),
        cost_estimate=cost,
    )(y_fold, prep["w1"], prep["b1"], prep["w2"], prep["b2"], w3, b3)

    # Unfold back: row-major reshape, drop padded rows, restore leading dims.
    out2 = out_f.reshape(-1, D)[:B]
    return out2.reshape(*lead_shape, D)


# ------------------------------ public API ----------------------------------

def defunc_forward(t_current, y_current, params, *, backwards=False,
                   batch_tile=None, mxu_dtype=jnp.bfloat16):
    """Pallas implementation of DEFunc.forward (single call).

    t_current is accepted for API parity but, exactly as in the PyTorch
    module's get_ode_gradient, does not enter the computation.  MXU operands
    default to bf16 (f32 accumulation / bias / tanh); pass
    mxu_dtype=jnp.float32 for an exact-f32 matmul path.  For repeated
    evaluation inside an ODE solve prefer make_defunc(), which folds the
    weights once instead of per call."""
    del t_current  # unused, matches get_ode_gradient semantics
    prep = prepare_defunc_params(params, mxu_dtype=mxu_dtype)
    return _defunc_apply(y_current, prep, backwards=backwards,
                         batch_tile=batch_tile)


def make_defunc(params, mxu_dtype=jnp.bfloat16, batch_tile=None):
    """Return defunc(t, y, backwards=False) with weight folding amortized."""
    prep = prepare_defunc_params(params, mxu_dtype=mxu_dtype)

    def defunc(t_current, y_current, backwards=False):
        del t_current
        return _defunc_apply(y_current, prep, backwards=backwards,
                             batch_tile=batch_tile)

    return defunc


def init_defunc_params(key, latent_dim, hidden_dim, dtype=jnp.float32):
    """Deterministic synthetic init (normal, std=0.1 — mirrors utils.init_weight)."""
    k1, k2, k3 = jax.random.split(key, 3)
    std = 0.1
    w1 = std * jax.random.normal(k1, (latent_dim, hidden_dim), dtype)
    b1 = jnp.zeros((1, hidden_dim), dtype)
    w2 = std * jax.random.normal(k2, (hidden_dim, hidden_dim), dtype)
    b2 = jnp.zeros((1, hidden_dim), dtype)
    w3 = std * jax.random.normal(k3, (hidden_dim, latent_dim), dtype)
    b3 = jnp.zeros((1, latent_dim), dtype)
    return (w1, b1, w2, b2, w3, b3)


def _reference_forward(t_current, y, params, backwards=False):
    del t_current
    w1, b1, w2, b2, w3, b3 = params
    y = y.astype(jnp.float32)
    h1 = jnp.tanh(y @ w1.astype(jnp.float32) + b1.astype(jnp.float32).reshape(1, -1))
    h2 = jnp.tanh(h1 @ w2.astype(jnp.float32) + b2.astype(jnp.float32).reshape(1, -1))
    out = h2 @ w3.astype(jnp.float32) + b3.astype(jnp.float32).reshape(1, -1)
    return -out if backwards else out


if __name__ == "__main__":
    key = jax.random.PRNGKey(0)
    k_param, k_y1, k_y2, k_y3, k_y4 = jax.random.split(key, 5)

    latent_dim, hidden_dim = 32, 64          # fold=4, folded hidden=256
    params = init_defunc_params(k_param, latent_dim, hidden_dim)
    t_current = jnp.float32(0.5)             # unused by the gradient net

    # --- case 1: tiny batch, f32 input, default bf16-MXU, forward+backwards --
    B1 = 8
    y1 = jax.random.normal(k_y1, (B1, latent_dim), jnp.float32)
    g1 = defunc_forward(t_current, y1, params, backwards=False)
    g1b = defunc_forward(t_current, y1, params, backwards=True)
    jax.block_until_ready((g1, g1b))
    r1 = _reference_forward(t_current, y1, params)
    assert g1.shape == (B1, latent_dim)
    assert jnp.allclose(g1, r1, atol=3e-2, rtol=3e-2)
    assert jnp.allclose(g1b, -r1, atol=3e-2, rtol=3e-2)
    assert jnp.allclose(g1b, -g1, atol=1e-6)          # sign folded into W3/b3

    # --- case 2: ragged 3-D batch, forced tiling (grid=4, single pad) --------
    y2 = jax.random.normal(k_y2, (5, 40, latent_dim), jnp.float32)
    defunc_tiled = make_defunc(params, batch_tile=64)
    g2 = defunc_tiled(t_current, y2)
    jax.block_until_ready(g2)
    r2 = _reference_forward(t_current, y2, params)
    assert g2.shape == (5, 40, latent_dim)
    assert jnp.allclose(g2, r2, atol=3e-2, rtol=3e-2)

    # --- case 3: exact-f32 MXU path (mxu_dtype=float32) -----------------------
    B3 = 64
    y3 = jax.random.normal(k_y3, (B3, latent_dim), jnp.float32)
    defunc_f32 = make_defunc(params, mxu_dtype=jnp.float32)
    g3 = defunc_f32(t_current, y3)
    jax.block_until_ready(g3)
    r3 = _reference_forward(t_current, y3, params)
    assert g3.shape == (B3, latent_dim)
    assert jnp.allclose(g3, r3, atol=1e-5, rtol=1e-5)

    # --- case 4: bf16 inputs and weights --------------------------------------
    params_bf16 = tuple(p.astype(jnp.bfloat16) for p in params)
    B4 = 48
    y4 = jax.random.normal(k_y4, (B4, latent_dim), jnp.float32).astype(jnp.bfloat16)
    defunc_bf16 = make_defunc(params_bf16)
    g4 = defunc_bf16(t_current, y4)
    jax.block_until_ready(g4)
    r4 = _reference_forward(t_current, y4, params_bf16)
    assert g4.shape == (B4, latent_dim)
    assert jnp.allclose(g4.astype(jnp.float32), r4, atol=5e-2, rtol=5e-2)

    print("KERNEL_OK")
</pallas_src>

<mosaic_0001>
module attributes {stable_mosaic.version = 11 : i64} {
  func.func @_defunc_kernel(%arg0: i32, %arg1: memref<2x128xf32, #tpu.memory_space<vmem>>, %arg2: memref<128x256xbf16, #tpu.memory_space<vmem>>, %arg3: memref<1x256xf32, #tpu.memory_space<vmem>>, %arg4: memref<256x256xbf16, #tpu.memory_space<vmem>>, %arg5: memref<1x256xf32, #tpu.memory_space<vmem>>, %arg6: memref<256x128xbf16, #tpu.memory_space<vmem>>, %arg7: memref<1x128xf32, #tpu.memory_space<vmem>>, %arg8: memref<2x128xf32, #tpu.memory_space<vmem>>) attributes {dimension_semantics = [#tpu.dimension_semantics<parallel>], iteration_bounds = array<i64: 1>, scalar_prefetch = 0 : i64, scratch_operands = 0 : i64, tpu.core_type = #tpu.core_type<tc>, window_params = [{transform_indices = @transform_0, window_bounds = array<i64: 2, 128>}, {pipeline_mode = #tpu.pipeline_mode<synchronous>, transform_indices = @transform_1, window_bounds = array<i64: 128, 256>}, {pipeline_mode = #tpu.pipeline_mode<synchronous>, transform_indices = @transform_2, window_bounds = array<i64: 1, 256>}, {pipeline_mode = #tpu.pipeline_mode<synchronous>, transform_indices = @transform_3, window_bounds = array<i64: 256, 256>}, {pipeline_mode = #tpu.pipeline_mode<synchronous>, transform_indices = @transform_4, window_bounds = array<i64: 1, 256>}, {pipeline_mode = #tpu.pipeline_mode<synchronous>, transform_indices = @transform_5, window_bounds = array<i64: 256, 128>}, {pipeline_mode = #tpu.pipeline_mode<synchronous>, transform_indices = @transform_6, window_bounds = array<i64: 1, 128>}, {transform_indices = @transform_7, window_bounds = array<i64: 2, 128>}]} {
    %c0 = arith.constant 0 : index
    %c0_0 = arith.constant 0 : index
    %0 = vector.load %arg1[%c0, %c0_0] : memref<2x128xf32, #tpu.memory_space<vmem>>, vector<2x128xf32>
    %1 = arith.truncf %0 : vector<2x128xf32> to vector<2x128xbf16>
    %c0_1 = arith.constant 0 : index
    %c0_2 = arith.constant 0 : index
    %2 = vector.load %arg2[%c0_1, %c0_2] : memref<128x256xbf16, #tpu.memory_space<vmem>>, vector<128x256xbf16>
    %cst = arith.constant dense<0.000000e+00> : vector<2x256xf32>
    %3 = tpu.matmul %1, %2, %cst {dimension_numbers = #tpu.dot_dimension_numbers<[1], [0], [0], [1], [0, 0, 1, 1], [], []>} : vector<2x128xbf16>, vector<128x256xbf16>, vector<2x256xf32> -> vector<2x256xf32>
    %c0_3 = arith.constant 0 : index
    %c0_4 = arith.constant 0 : index
    %4 = vector.load %arg3[%c0_3, %c0_4] : memref<1x256xf32, #tpu.memory_space<vmem>>, vector<1x256xf32>
    %5 = vector.broadcast %4 : vector<1x256xf32> to vector<2x256xf32>
    %6 = arith.addf %3, %5 : vector<2x256xf32>
    %7 = math.tanh %6 : vector<2x256xf32>
    %8 = arith.truncf %7 : vector<2x256xf32> to vector<2x256xbf16>
    %c0_5 = arith.constant 0 : index
    %c0_6 = arith.constant 0 : index
    %9 = vector.load %arg4[%c0_5, %c0_6] : memref<256x256xbf16, #tpu.memory_space<vmem>>, vector<256x256xbf16>
    %cst_7 = arith.constant dense<0.000000e+00> : vector<2x256xf32>
    %10 = tpu.matmul %8, %9, %cst_7 {dimension_numbers = #tpu.dot_dimension_numbers<[1], [0], [0], [1], [0, 0, 1, 1], [], []>} : vector<2x256xbf16>, vector<256x256xbf16>, vector<2x256xf32> -> vector<2x256xf32>
    %c0_8 = arith.constant 0 : index
    %c0_9 = arith.constant 0 : index
    %11 = vector.load %arg5[%c0_8, %c0_9] : memref<1x256xf32, #tpu.memory_space<vmem>>, vector<1x256xf32>
    %12 = vector.broadcast %11 : vector<1x256xf32> to vector<2x256xf32>
    %13 = arith.addf %10, %12 : vector<2x256xf32>
    %14 = math.tanh %13 : vector<2x256xf32>
    %15 = arith.truncf %14 : vector<2x256xf32> to vector<2x256xbf16>
    %c0_10 = arith.constant 0 : index
    %c0_11 = arith.constant 0 : index
    %16 = vector.load %arg6[%c0_10, %c0_11] : memref<256x128xbf16, #tpu.memory_space<vmem>>, vector<256x128xbf16>
    %cst_12 = arith.constant dense<0.000000e+00> : vector<2x128xf32>
    %17 = tpu.matmul %15, %16, %cst_12 {dimension_numbers = #tpu.dot_dimension_numbers<[1], [0], [0], [1], [0, 0, 1, 1], [], []>} : vector<2x256xbf16>, vector<256x128xbf16>, vector<2x128xf32> -> vector<2x128xf32>
    %c0_13 = arith.constant 0 : index
    %c0_14 = arith.constant 0 : index
    %18 = vector.load %arg7[%c0_13, %c0_14] : memref<1x128xf32, #tpu.memory_space<vmem>>, vector<1x128xf32>
    %19 = vector.broadcast %18 : vector<1x128xf32> to vector<2x128xf32>
    %20 = arith.addf %17, %19 : vector<2x128xf32>
    %c0_15 = arith.constant 0 : index
    %c0_16 = arith.constant 0 : index
    %21 = vector.load %arg8[%c0_15, %c0_16] : memref<2x128xf32, #tpu.memory_space<vmem>>, vector<2x128xf32>
    tpu.vector_store %arg8[%c0_15, %c0_16], %20 {strides = array<i32>} : memref<2x128xf32, #tpu.memory_space<vmem>>, vector<2x128xf32>,
    return
  }
  func.func @transform_0(%arg0: i32) -> (i32, i32) {
    %c0_i32 = arith.constant 0 : i32
    %c0_i32_0 = arith.constant 0 : i32
    return %arg0, %c0_i32 : i32, i32
  }
  func.func @transform_1(%arg0: i32) -> (i32, i32) {
    %c0_i32 = arith.constant 0 : i32
    %c0_i32_0 = arith.constant 0 : i32
    %c0_i32_1 = arith.constant 0 : i32
    return %c0_i32, %c0_i32_0 : i32, i32
  }
  func.func @transform_2(%arg0: i32) -> (i32, i32) {
    %c0_i32 = arith.constant 0 : i32
    %c0_i32_0 = arith.constant 0 : i32
    %c0_i32_1 = arith.constant 0 : i32
    return %c0_i32, %c0_i32_0 : i32, i32
  }
  func.func @transform_3(%arg0: i32) -> (i32, i32) {
    %c0_i32 = arith.constant 0 : i32
    %c0_i32_0 = arith.constant 0 : i32
    %c0_i32_1 = arith.constant 0 : i32
    return %c0_i32, %c0_i32_0 : i32, i32
  }
  func.func @transform_4(%arg0: i32) -> (i32, i32) {
    %c0_i32 = arith.constant 0 : i32
    %c0_i32_0 = arith.constant 0 : i32
    %c0_i32_1 = arith.constant 0 : i32
    return %c0_i32, %c0_i32_0 : i32, i32
  }
  func.func @transform_5(%arg0: i32) -> (i32, i32) {
    %c0_i32 = arith.constant 0 : i32
    %c0_i32_0 = arith.constant 0 : i32
    %c0_i32_1 = arith.constant 0 : i32
    return %c0_i32, %c0_i32_0 : i32, i32
  }
  func.func @transform_6(%arg0: i32) -> (i32, i32) {
    %c0_i32 = arith.constant 0 : i32
    %c0_i32_0 = arith.constant 0 : i32
    %c0_i32_1 = arith.constant 0 : i32
    return %c0_i32, %c0_i32_0 : i32, i32
  }
  func.func @transform_7(%arg0: i32) -> (i32, i32) {
    %c0_i32 = arith.constant 0 : i32
    %c0_i32_0 = arith.constant 0 : i32
    return %arg0, %c0_i32 : i32, i32
  }
}

</mosaic_0001>

<bundles_post_ra>
// kernel: tpu_custom_call.1
= control target key start
LH: loop header
LB: loop body
LE: loop exit
PB: predicated region body
PF: predicated region fallthrough
CT: control target
= control target key end

     0   :  { %12 = vsyncpa [#allocation3], 0  ;;  %s1232_s0 = inlined_call_operand.hbm [shape: f32[2,128], index: 0, kind: input, shape index: {}]   ;;  %s1233_s1 = inlined_call_operand.hbm [shape: bf16[128,256], index: 1, kind: input, shape index: {}]   ;;  %s1234_s2 = inlined_call_operand.hbm [shape: f32[1,256], index: 2, kind: input, shape index: {}]   ;;  %s1235_s3 = inlined_call_operand.hbm [shape: bf16[256,256], index: 3, kind: input, shape index: {}]   ;;  %s1236_s4 = inlined_call_operand.vmem [shape: f32[1,256], index: 4, kind: input, shape index: {}]   ;;  %s1237_s5 = inlined_call_operand.hbm [shape: bf16[256,128], index: 5, kind: input, shape index: {}]   ;;  %s1238_s6 = inlined_call_operand.vmem [shape: f32[1,128], index: 6, kind: input, shape index: {}]   ;;  %s1239_s7 = inlined_call_operand.hbm [shape: f32[2,128], index: 7, kind: output, shape index: {}]  }
   0x1   :  { %13 = vsyncpa [#allocation6], 0 }
   0x2   :  { %14 = vsyncpa [#allocation9], 0  ;;  %s31_s26 = sshll.u32 %s1233_s1, 4  ;;  %s32_s26 = int_to_ptr.hbm [resolvable:$true] %s31_s26 }
   0x3   :  { %15 = vsyncpa [#allocation4], 0  ;;  %s1158_s27 = smov [#allocation5]   ;;  %s55_s8 = sshll.u32 %s1235_s3, 4  ;;  %s56_s8 = int_to_ptr.hbm [resolvable:$true] %s55_s8 }
   0x4   :  { %s33_s28 = sshll.u32 %s1158_s27, 4  ;;  %s1159_s9 = smov 128   ;;  %s34_s28 = int_to_ptr.vmem [resolvable:$true] %s33_s28 }
   0x5   :  { %s1160_s10 = smov 8   ;;  %s1161_s11 = smov [#allocation8]  }
   0x6   :  { %39 = dma.hbm_to_vmem [thread:$0]  %s32_s26, 2048, %s34_s28, [#allocation6], %s1159_s9, %s1159_s9, %s1160_s10  }
   0x7   :  { %s57_s12 = sshll.u32 %s1161_s11, 4  ;;  %s21_s15 = sshll.u32 %s1232_s0, 4  ;;  %s58_s12 = int_to_ptr.vmem [resolvable:$true] %s57_s12  ;;  %s22_s15 = int_to_ptr.hbm [resolvable:$true] %s21_s15 }
   0x8   :  { %63 = dma.hbm_to_vmem [thread:$0]  %s56_s8, 4096, %s58_s12, [#allocation9], %s1159_s9, %s1159_s9, %s1160_s10  }
   0x9   :  { %s45_s17 = sshll.u32 %s1234_s2, 4  ;;  %s1162_s18 = smov [#allocation2]   ;;  %s46_s17 = int_to_ptr.hbm [resolvable:$true] %s45_s17 }
   0xa   :  { %s23_s19 = sshll.u32 %s1162_s18, 4  ;;  %s1163_s3 = smov [#allocation7]   ;;  %s24_s19 = int_to_ptr.vmem [resolvable:$true] %s23_s19 }
   0xb   :  { %26 = dma.hbm_to_vmem [thread:$0]  %s22_s15, 32, %s24_s19, [#allocation3]  }
   0xc   :  { %s47_s20 = sshll.u32 %s1163_s3, 4  ;;  %s70_s23 = sshll.u32 %s1237_s5, 4  ;;  %s48_s20 = int_to_ptr.vmem [resolvable:$true] %s47_s20  ;;  %s71_s23 = int_to_ptr.hbm [resolvable:$true] %s70_s23 }
   0xd   :  { %50 = dma.hbm_to_vmem [thread:$0]  %s46_s17, 32, %s48_s20, [#allocation6]  }
   0xe   :  { %s1164_s0 = smov [#allocation10]   ;;  %s1165_s25 = smov 64  }
   0xf   :  { %s72_s24 = sshll.u32 %s1164_s0, 4  ;;  %s1166_s26 = smov 4   ;;  %s73_s24 = int_to_ptr.vmem [resolvable:$true] %s72_s24 }
  0x10   :  { %78 = dma.hbm_to_vmem [thread:$0]  %s71_s23, 2048, %s73_s24, [#allocation9], %s1165_s25, %s1165_s25, %s1166_s26  }
  0x11   :  { %1150 = dma.done.wait [#allocation3], 32  }
  0x12   :  { %1151 = vsyncadd [#allocation3], 4294967264 }
  0x13   :  { %1152 = dma.done.wait [#allocation6], 2080  }
  0x14   :  { %1153 = vsyncadd [#allocation6], 4294965216 }
  0x15   :  { %1154 = dma.done.wait [#allocation9], 6144  }
  0x16   :  { %1155 = vsyncadd [#allocation9], 4294961152  ;;  %v725_v0 = vld [vmem:[#allocation5 + $0x70] sm:$0xf]  ;;  %v938_v1 = vld [vmem:[#allocation5 + $0x74] sm:$0xf0] }
  0x17   :  { %v937_v2 = vld [vmem:[#allocation5 + $0x74] sm:$0xf]  ;;  %v726_v3 = vor.u32 %v938_v1, %v725_v0  ;;  %v727_v4 = vld [vmem:[#allocation5 + $0x78] sm:$0xf0]  ;;  %v717_v5 = vld [vmem:[#allocation5 + $0x60] sm:$0xf] }
  0x18   :  { %v936_v6 = vld [vmem:[#allocation5 + $0x64] sm:$0xf0]  ;;  %v730_v7 = vor.u32 %v937_v2, %v727_v4  ;;  %v935_v8 = vld [vmem:[#allocation5 + $0x64] sm:$0xf]  ;;  %v719_v9 = vld [vmem:[#allocation5 + $0x68] sm:$0xf0] }
  0x19   :  { %205 = vmatpush.bf16.msra.mxu0 %v726_v3  ;;  %v718_v10 = vor.u32 %v936_v6, %v717_v5  ;;  %v722_v11 = vor.u32 %v935_v8, %v719_v9  ;;  %v709_v12 = vld [vmem:[#allocation5 + $0x50] sm:$0xf]  ;;  %v934_v13 = vld [vmem:[#allocation5 + $0x54] sm:$0xf0]  ;;  %v933_v14 = vld [vmem:[#allocation5 + $0x54] sm:$0xf] }
  0x1a   :  { %218 = vmatpush.bf16.msra.mxu1 %v730_v7  ;;  %v711_v15 = vld [vmem:[#allocation5 + $0x58] sm:$0xf0]  ;;  %v710_v16 = vor.u32 %v934_v13, %v709_v12  ;;  %v701_v18 = vld [vmem:[#allocation5 + $0x40] sm:$0xf]  ;;  %v932_v19 = vld [vmem:[#allocation5 + $0x44] sm:$0xf0] }
  0x1b   :  { %v714_v17 = vor.u32 %v933_v14, %v711_v15  ;;  %v931_v20 = vld [vmem:[#allocation5 + $0x44] sm:$0xf]  ;;  %v703_v21 = vld [vmem:[#allocation5 + $0x48] sm:$0xf0]  ;;  %v702_v22 = vor.u32 %v932_v19, %v701_v18  ;;  %v789_v23 = vld [vmem:[#allocation8 + $0x70] sm:$0xf] }
  0x1c   :  { %v954_v24 = vld [vmem:[#allocation8 + $0x74] sm:$0xf0]  ;;  %v853_v25 = vld [vmem:[#allocation8 + $0xf0] sm:$0xf]  ;;  %v706_v26 = vor.u32 %v931_v20, %v703_v21  ;;  %v781_v34 = vld [vmem:[#allocation8 + $0x60] sm:$0xf] }
  0x1d   :  { %206 = vmatpush.bf16.msra.mxu0 %v718_v10  ;;  %v693_v27 = vld [vmem:[#allocation5 + $0x30] sm:$0xf]  ;;  %v930_v28 = vld [vmem:[#allocation5 + $0x34] sm:$0xf0]  ;;  %v790_v29 = vor.u32 %v954_v24, %v789_v23  ;;  %v929_v31 = vld [vmem:[#allocation5 + $0x34] sm:$0xf] }
  0x1e   :  { %219 = vmatpush.bf16.msra.mxu1 %v722_v11  ;;  %v970_v30 = vld [vmem:[#allocation8 + $0xf4] sm:$0xf0]  ;;  %v952_v35 = vld [vmem:[#allocation8 + $0x64] sm:$0xf0]  ;;  %v845_v36 = vld [vmem:[#allocation8 + $0xe0] sm:$0xf]  ;;  %v694_v38 = vor.u32 %v930_v28, %v693_v27 }
  0x1f   :  { %v695_v32 = vld [vmem:[#allocation5 + $0x38] sm:$0xf0]  ;;  %v854_v33 = vor.u32 %v970_v30, %v853_v25  ;;  %433 = vmatpush.bf16.msra.mxu2 %v790_v29  ;;  %v968_v37 = vld [vmem:[#allocation8 + $0xe4] sm:$0xf0]  ;;  %v685_v39 = vld [vmem:[#allocation5 + $0x20] sm:$0xf]  ;;  %v782_v41 = vor.u32 %v952_v35, %v781_v34 }
  0x20   :  { %v928_v40 = vld [vmem:[#allocation5 + $0x24] sm:$0xf0]  ;;  %v846_v42 = vor.u32 %v968_v37, %v845_v36  ;;  %v698_v43 = vor.u32 %v929_v31, %v695_v32  ;;  %v927_v44 = vld [vmem:[#allocation5 + $0x24] sm:$0xf]  ;;  %v773_v45 = vld [vmem:[#allocation8 + $0x50] sm:$0xf] }
  0x21   :  { %207 = vmatpush.bf16.msra.mxu0 %v710_v16  ;;  %446 = vmatpush.bf16.msra.mxu3 %v854_v33  ;;  %v950_v46 = vld [vmem:[#allocation8 + $0x54] sm:$0xf0]  ;;  %v687_v47 = vld [vmem:[#allocation5 + $0x28] sm:$0xf0]  ;;  %v837_v48 = vld [vmem:[#allocation8 + $0xd0] sm:$0xf]  ;;  %v686_v51 = vor.u32 %v928_v40, %v685_v39 }
  0x22   :  { %220 = vmatpush.bf16.msra.mxu1 %v714_v17  ;;  %v966_v49 = vld [vmem:[#allocation8 + $0xd4] sm:$0xf0]  ;;  %v774_v50 = vor.u32 %v950_v46, %v773_v45  ;;  %v677_v52 = vld [vmem:[#allocation5 + $0x10] sm:$0xf]  ;;  %v765_v54 = vld [vmem:[#allocation8 + $0x40] sm:$0xf]  ;;  %v690_v56 = vor.u32 %v927_v44, %v687_v47 }
  0x23   :  { %434 = vmatpush.bf16.msra.mxu2 %v782_v41  ;;  %v838_v53 = vor.u32 %v966_v49, %v837_v48  ;;  %v948_v55 = vld [vmem:[#allocation8 + $0x44] sm:$0xf0]  ;;  %v926_v57 = vld [vmem:[#allocation5 + $0x14] sm:$0xf0]  ;;  %v829_v58 = vld [vmem:[#allocation8 + $0xc0] sm:$0xf] }
  0x24   :  { %v964_v59 = vld [vmem:[#allocation8 + $0xc4] sm:$0xf0]  ;;  %v925_v60 = vld [vmem:[#allocation5 + $0x14] sm:$0xf]  ;;  %v679_v61 = vld [vmem:[#allocation5 + $0x18] sm:$0xf0]  ;;  %v766_v0 = vor.u32 %v948_v55, %v765_v54  ;;  %v678_v1 = vor.u32 %v926_v57, %v677_v52 }
  0x25   :  { %208 = vmatpush.bf16.msra.mxu0 %v702_v22  ;;  %447 = vmatpush.bf16.msra.mxu3 %v846_v42  ;;  %v669_v62 = vld [vmem:[#allocation5] sm:$0xf]  ;;  %v924_v63 = vld [vmem:[#allocation5 + $0x4] sm:$0xf0]  ;;  %v923_v2 = vld [vmem:[#allocation5 + $0x4] sm:$0xf]  ;;  %v830_v3 = vor.u32 %v964_v59, %v829_v58  ;;  %v682_v6 = vor.u32 %v925_v60, %v679_v61 }
  0x26   :  { %221 = vmatpush.bf16.msra.mxu1 %v706_v26  ;;  %v757_v4 = vld [vmem:[#allocation8 + $0x30] sm:$0xf]  ;;  %v946_v5 = vld [vmem:[#allocation8 + $0x34] sm:$0xf0]  ;;  %v671_v9 = vld [vmem:[#allocation5 + $0x8] sm:$0xf0]  ;;  %v670_v15 = vor.u32 %v924_v63, %v669_v62 }
  0x27   :  { %435 = vmatpush.bf16.msra.mxu2 %v774_v50  ;;  %v821_v7 = vld [vmem:[#allocation8 + $0xb0] sm:$0xf]  ;;  %v962_v8 = vld [vmem:[#allocation8 + $0xb4] sm:$0xf0]  ;;  %v953_v10 = vld [vmem:[#allocation8 + $0x74] sm:$0xf]  ;;  %v758_v14 = vor.u32 %v946_v5, %v757_v4  ;;  %v674_v18 = vor.u32 %v923_v2, %v671_v9 }
  0x28   :  { %v791_v11 = vld [vmem:[#allocation8 + $0x78] sm:$0xf0]  ;;  %v969_v12 = vld [vmem:[#allocation8 + $0xf4] sm:$0xf]  ;;  %v822_v17 = vor.u32 %v962_v8, %v821_v7  ;;  %v951_v21 = vld [vmem:[#allocation8 + $0x64] sm:$0xf] }
  0x29   :  { %209 = vmatpush.bf16.msra.mxu0 %v694_v38  ;;  %448 = vmatpush.bf16.msra.mxu3 %v838_v53  ;;  %v855_v13 = vld [vmem:[#allocation8 + $0xf8] sm:$0xf0]  ;;  %v794_v19 = vor.u32 %v953_v10, %v791_v11  ;;  %v783_v22 = vld [vmem:[#allocation8 + $0x68] sm:$0xf0]  ;;  %v967_v24 = vld [vmem:[#allocation8 + $0xe4] sm:$0xf] }
  0x2a   :  { %222 = vmatpush.bf16.msra.mxu1 %v698_v43  ;;  %v101_v16 = vld [vmem:[#allocation2] sm:$0x3]  ;;  %v858_v20 = vor.u32 %v969_v12, %v855_v13  ;;  %v847_v25 = vld [vmem:[#allocation8 + $0xe8] sm:$0xf0]  ;;  %v786_v26 = vor.u32 %v951_v21, %v783_v22  ;;  %v949_v28 = vld [vmem:[#allocation8 + $0x54] sm:$0xf] }
  0x2b   :  { %436 = vmatpush.bf16.msra.mxu2 %v766_v0  ;;  %v102_v23 = vpack.c.bf16 %v101_v16, %v101_v16  ;;  %v850_v27 = vor.u32 %v967_v24, %v847_v25  ;;  %v775_v29 = vld [vmem:[#allocation8 + $0x58] sm:$0xf0]  ;;  %v965_v30 = vld [vmem:[#allocation8 + $0xd4] sm:$0xf]  ;;  %v947_v34 = vld [vmem:[#allocation8 + $0x44] sm:$0xf] }
  0x2c   :  { %v839_v31 = vld [vmem:[#allocation8 + $0xd8] sm:$0xf0]  ;;  %v778_v32 = vor.u32 %v949_v28, %v775_v29  ;;  %v767_v35 = vld [vmem:[#allocation8 + $0x48] sm:$0xf0]  ;;  %v963_v36 = vld [vmem:[#allocation8 + $0xc4] sm:$0xf] }
  0x2d   :  { %210 = vmatpush.bf16.msra.mxu0 %v686_v51  ;;  %449 = vmatpush.bf16.msra.mxu3 %v830_v3  ;;  %v842_v33 = vor.u32 %v965_v30, %v839_v31  ;;  %v831_v37 = vld [vmem:[#allocation8 + $0xc8] sm:$0xf0]  ;;  %v770_v38 = vor.u32 %v947_v34, %v767_v35  ;;  %v945_v40 = vld [vmem:[#allocation8 + $0x34] sm:$0xf]  ;;  %v759_v41 = vld [vmem:[#allocation8 + $0x38] sm:$0xf0] }
  0x2e   :  { %223 = vmatpush.bf16.msra.mxu1 %v690_v56  ;;  %v834_v39 = vor.u32 %v963_v36, %v831_v37  ;;  %v961_v42 = vld [vmem:[#allocation8 + $0xb4] sm:$0xf]  ;;  %v823_v43 = vld [vmem:[#allocation8 + $0xb8] sm:$0xf0]  ;;  %v762_v44 = vor.u32 %v945_v40, %v759_v41  ;;  %v749_v46 = vld [vmem:[#allocation8 + $0x20] sm:$0xf] }
  0x2f   :  { %437 = vmatpush.bf16.msra.mxu2 %v758_v14  ;;  %v826_v45 = vor.u32 %v961_v42, %v823_v43  ;;  %v944_v47 = vld [vmem:[#allocation8 + $0x24] sm:$0xf0]  ;;  %v813_v48 = vld [vmem:[#allocation8 + $0xa0] sm:$0xf]  ;;  %v943_v51 = vld [vmem:[#allocation8 + $0x24] sm:$0xf] }
  0x30   :  { %v750_v49 = vor.u32 %v944_v47, %v749_v46  ;;  %v960_v50 = vld [vmem:[#allocation8 + $0xa4] sm:$0xf0]  ;;  %v751_v53 = vld [vmem:[#allocation8 + $0x28] sm:$0xf0]  ;;  %v959_v54 = vld [vmem:[#allocation8 + $0xa4] sm:$0xf] }
  0x31   :  { %211 = vmatpush.bf16.msra.mxu0 %v678_v1  ;;  %450 = vmatpush.bf16.msra.mxu3 %v822_v17  ;;  %v814_v52 = vor.u32 %v960_v50, %v813_v48  ;;  %v815_v55 = vld [vmem:[#allocation8 + $0xa8] sm:$0xf0]  ;;  %v754_v56 = vor.u32 %v943_v51, %v751_v53  ;;  %v741_v58 = vld [vmem:[#allocation8 + $0x10] sm:$0xf]  ;;  %v942_v59 = vld [vmem:[#allocation8 + $0x14] sm:$0xf0] }
  0x32   :  { %224 = vmatpush.bf16.msra.mxu1 %v682_v6  ;;  %v818_v57 = vor.u32 %v959_v54, %v815_v55  ;;  %v805_v60 = vld [vmem:[#allocation8 + $0x90] sm:$0xf]  ;;  %v742_v61 = vor.u32 %v942_v59, %v741_v58  ;;  %v958_v62 = vld [vmem:[#allocation8 + $0x94] sm:$0xf0]  ;;  %v941_v63 = vld [vmem:[#allocation8 + $0x14] sm:$0xf] }
  0x33   :  { %438 = vmatpush.bf16.msra.mxu2 %v750_v49  ;;  %v743_v0 = vld [vmem:[#allocation8 + $0x18] sm:$0xf0]  ;;  %v806_v1 = vor.u32 %v958_v62, %v805_v60  ;;  %v957_v3 = vld [vmem:[#allocation8 + $0x94] sm:$0xf]  ;;  %v733_v6 = vld [vmem:[#allocation8] sm:$0xf] }
  0x34   :  { %v746_v2 = vor.u32 %v941_v63, %v743_v0  ;;  %v807_v4 = vld [vmem:[#allocation8 + $0x98] sm:$0xf0]  ;;  %v940_v7 = vld [vmem:[#allocation8 + $0x4] sm:$0xf0]  ;;  %v797_v8 = vld [vmem:[#allocation8 + $0x80] sm:$0xf] }
  0x35   :  { %212 = vmatpush.bf16.msra.mxu0 %v670_v15  ;;  %451 = vmatpush.bf16.msra.mxu3 %v814_v52  ;;  %v810_v5 = vor.u32 %v957_v3, %v807_v4  ;;  %v734_v9 = vor.u32 %v940_v7, %v733_v6  ;;  %v956_v10 = vld [vmem:[#allocation8 + $0x84] sm:$0xf0]  ;;  %v939_v11 = vld [vmem:[#allocation8 + $0x4] sm:$0xf]  ;;  %v735_v12 = vld [vmem:[#allocation8 + $0x8] sm:$0xf0] }
  0x36   :  { %225 = vmatpush.bf16.msra.mxu1 %v674_v18  ;;  %v798_v13 = vor.u32 %v956_v10, %v797_v8  ;;  %v738_v14 = vor.u32 %v939_v11, %v735_v12  ;;  %v955_v15 = vld [vmem:[#allocation8 + $0x84] sm:$0xf]  ;;  %v799_v16 = vld [vmem:[#allocation8 + $0x88] sm:$0xf0]  ;;  %v986_v18 = vld [vmem:[#allocation10 + $0x78] sm:$0xff]  ;;  %s1167_s28 = smov [#allocation11]  }
  0x37   :  { %439 = vmatpush.bf16.msra.mxu2 %v742_v61  ;;  %v802_v17 = vor.u32 %v955_v15, %v799_v16  ;;  %v977_v21 = vld [vmem:[#allocation10 + $0x30] sm:$0xff]  ;;  %v984_v22 = vld [vmem:[#allocation10 + $0x68] sm:$0xff]  ;;  %v983_v24 = vld [vmem:[#allocation10 + $0x60] sm:$0xff]  ;;  %s653_s29 = sshll.u32 %s1167_s28, 4  ;;  %s655_s9 = sshll.u32 %s1239_s7, 4  ;;  %s654_s29 = int_to_ptr.vmem [resolvable:$true] %s653_s29  ;;  %s656_s9 = int_to_ptr.hbm [resolvable:$true] %s655_s9 }
  0x38   :  { %213 = vmatmul.bf16.vlgmr.msra.gmra.mxu0 %v102_v23  ;;  %v119_v25 = vld [vmem:[#allocation7] sm:$0x3]  ;;  %v981_v40 = vld [vmem:[#allocation10 + $0x50] sm:$0xff]  ;;  %v980_v42 = vld [vmem:[#allocation10 + $0x48] sm:$0xff] }
  0x39   :  { %459 = vmatpush.bf16.msrb.mxu0 %v794_v19  ;;  %226 = vmatmul.bf16.vlgmr.msra.gmra.mxu1 %v102_v23  ;;  %v978_v19 = vld [vmem:[#allocation10 + $0x38] sm:$0xff]  ;;  %v976_v23 = vld [vmem:[#allocation10 + $0x28] sm:$0xff]  ;;  %v122_v28 = vperm.slane %v119_v25, 1  ;;  %v973_v43 = vld [vmem:[#allocation10 + $0x10] sm:$0xff] }
  0x3a   :  { %472 = vmatpush.bf16.msrb.mxu1 %v858_v20  ;;  %452 = vmatpush.bf16.msra.mxu3 %v806_v1  ;;  %v985_v20 = vld [vmem:[#allocation10 + $0x70] sm:$0xff]  ;;  %v974_v41 = vld [vmem:[#allocation10 + $0x18] sm:$0xff]  ;;  %v971_v46 = vld [vmem:[#allocation10] sm:$0xff] }
  0x3b   :  { %440 = vmatpush.bf16.msra.mxu2 %v734_v9  ;;  %v267_v47 = vld [vmem:[%s1236_s4] sm:$0x3] }
  0x3c   :  { %v270_v48 = vperm.slane %v267_v47, 1  ;;  %v269_v53 = vperm.slane %v267_v47, 0  ;;  %v997_v3 = vld [vmem:[%s1238_s6] ss:$0 sm:$0xff] }
  0x3d   :  { %460 = vmatpush.bf16.msrb.mxu0 %v786_v26  ;;  %v982_v26 = vld [vmem:[#allocation10 + $0x58] sm:$0xff] }
  0x3e   :  { %473 = vmatpush.bf16.msrb.mxu1 %v850_v27  ;;  %453 = vmatpush.bf16.msra.mxu3 %v798_v13  ;;  %v121_v27 = vperm.slane %v119_v25, 0 }
  0x3f   :  { %621 = vmatpush.bf16.msrb.mxu2 %v978_v19 }
  0x41   :  { %461 = vmatpush.bf16.msrb.mxu0 %v778_v32 }
  0x42   :  { %474 = vmatpush.bf16.msrb.mxu1 %v842_v33  ;;  %634 = vmatpush.bf16.msrb.mxu3 %v986_v18 }
  0x43   :  { %622 = vmatpush.bf16.msrb.mxu2 %v977_v21 }
  0x45   :  { %462 = vmatpush.bf16.msrb.mxu0 %v770_v38 }
  0x46   :  { %475 = vmatpush.bf16.msrb.mxu1 %v834_v39  ;;  %635 = vmatpush.bf16.msrb.mxu3 %v985_v20  ;;  %v975_v39 = vld [vmem:[#allocation10 + $0x20] sm:$0xff] }
  0x47   :  { %623 = vmatpush.bf16.msrb.mxu2 %v976_v23 }
  0x49   :  { %463 = vmatpush.bf16.msrb.mxu0 %v762_v44  ;;  %v979_v44 = vld [vmem:[#allocation10 + $0x40] sm:$0xff] }
  0x4a   :  { %476 = vmatpush.bf16.msrb.mxu1 %v826_v45  ;;  %636 = vmatpush.bf16.msrb.mxu3 %v984_v22  ;;  %v972_v45 = vld [vmem:[#allocation10 + $0x8] sm:$0xff] }
  0x4b   :  { %624 = vmatpush.bf16.msrb.mxu2 %v975_v39 }
  0x4d   :  { %464 = vmatpush.bf16.msrb.mxu0 %v754_v56 }
  0x4e   :  { %477 = vmatpush.bf16.msrb.mxu1 %v818_v57  ;;  %637 = vmatpush.bf16.msrb.mxu3 %v983_v24 }
  0x4f   :  { %625 = vmatpush.bf16.msrb.mxu2 %v974_v41 }
  0x51   :  { %465 = vmatpush.bf16.msrb.mxu0 %v746_v2 }
  0x52   :  { %478 = vmatpush.bf16.msrb.mxu1 %v810_v5  ;;  %638 = vmatpush.bf16.msrb.mxu3 %v982_v26 }
  0x53   :  { %626 = vmatpush.bf16.msrb.mxu2 %v973_v43 }
  0x55   :  { %466 = vmatpush.bf16.msrb.mxu0 %v738_v14 }
  0x56   :  { %479 = vmatpush.bf16.msrb.mxu1 %v802_v17  ;;  %639 = vmatpush.bf16.msrb.mxu3 %v981_v40 }
  0x57   :  { %627 = vmatpush.bf16.msrb.mxu2 %v972_v45 }
  0x5a   :  { %640 = vmatpush.bf16.msrb.mxu3 %v980_v42 }
  0x5b   :  { %628 = vmatpush.bf16.msrb.mxu2 %v971_v46 }
  0x5e   :  { %641 = vmatpush.bf16.msrb.mxu3 %v979_v44 }
  0xb5   :  { %v214_v29 = vpop.f32.mrf.mxu0 }
  0xb6   :  { %v215_v30 = vadd.f32 %v214_v29, %v121_v27  ;;  %v227_v31 = vpop.f32.mrf.mxu1 }
  0xb7   :  { %v228_v32 = vadd.f32 %v227_v31, %v122_v28 }
  0xb8   :  { %998 = vtanh.f32 %v215_v30 }
  0xb9   :  { %1000 = vtanh.f32 %v228_v32 }
  0xbd   :  { %v216_v33 = vpop.f32.mrf.mxu0 }
  0xbe   :  { %v999_v34 = vpop.eup %998  ;;  %v229_v35 = vpop.f32.mrf.mxu1 }
  0xbf   :  { %v1001_v36 = vpop.eup %1000  ;;  %v233_v37 = vpack.c.bf16 %v999_v34, %v999_v34 }
  0xc0   :  { %v234_v38 = vpack.c.bf16 %v1001_v36, %v1001_v36 }
  0xc1   :  { %441 = vmatmul.bf16.vlgmr.msra.gmra.mxu2 %v233_v37  ;;  %467 = vmatmul.bf16.vlgmr.msrb.gmra.mxu0 %v233_v37 }
  0xc2   :  { %454 = vmatmul.bf16.vlgmr.msra.gmra.mxu3 %v234_v38  ;;  %480 = vmatmul.bf16.vlgmr.msrb.gmra.mxu1 %v234_v38 }
 0x13e   :  { %v468_v49 = vpop.f32.mrf.mxu0 }
 0x13f   :  { %v469_v50 = vadd.f32 %v468_v49, %v270_v48  ;;  %v481_v51 = vpop.f32.mrf.mxu1 }
 0x141   :  { %v482_v52 = vadd.f32 %v481_v51, %v469_v50 }
 0x143   :  { %1002 = vtanh.f32 %v482_v52 }
 0x144   :  { %v442_v54 = vpop.f32.mrf.mxu2 }
 0x145   :  { %v443_v55 = vadd.f32 %v442_v54, %v269_v53  ;;  %v455_v56 = vpop.f32.mrf.mxu3 }
 0x146   :  { %v470_v57 = vpop.f32.mrf.mxu0 }
 0x147   :  { %v456_v58 = vadd.f32 %v455_v56, %v443_v55  ;;  %v483_v59 = vpop.f32.mrf.mxu1 }
 0x149   :  { %v1003_v60 = vpop.eup %1002  ;;  %1004 = vtanh.f32 %v456_v58 }
 0x14a   :  { %v488_v61 = vpack.c.bf16 %v1003_v60, %v1003_v60 }
 0x14c   :  { %v444_v62 = vpop.f32.mrf.mxu2  ;;  %642 = vmatmul.bf16.vlgmr.msrb.gmra.mxu3 %v488_v61 }
 0x14d   :  { %v457_v63 = vpop.f32.mrf.mxu3 }
 0x14f   :  { %v1005_v0 = vpop.eup %1004 }
 0x150   :  { %v487_v1 = vpack.c.bf16 %v1005_v0, %v1005_v0 }
 0x152   :  { %629 = vmatmul.bf16.vlgmr.msrb.gmra.mxu2 %v487_v1 }
 0x1cf   :  { %v643_v2 = vpop.f32.mrf.mxu3 }
 0x1d5   :  { %v630_v4 = vpop.f32.mrf.mxu2 }
 0x1d6   :  { %v631_v5 = vadd.f32 %v997_v3, %v630_v4 }
 0x1d7   :  { %v645_v6 = vpop.f32.mrf.mxu3 }
 0x1d8   :  { %v644_v7 = vadd.f32 %v643_v2, %v631_v5 }
 0x1da   :  { %647 = vst [vmem:[#allocation11] sm:$0x3] %v644_v7 }
 0x1db   :  { %658 = dma.vmem_to_hbm [thread:$0]  %s654_s29, 32, %s656_s9, [#allocation4]  }
 0x1dd   :  { %v632_v8 = vpop.f32.mrf.mxu2 }
 0x1de   :  { %1156 = dma.done.wait [#allocation4], 32  }
 0x1df   :  { %1157 = vsyncadd [#allocation4], 4294967264 }
 0x1e0   :  { %663 = vsyncpa [#allocation3], 1 }
 0x1e1   :  { %664 = vsyncpa [#allocation6], 1 }
 0x1e2   :  { %665 = vsyncpa [#allocation9], 1 }
 0x1e3   :  { %666 = vsyncpa [#allocation4], 1 }

</bundles_post_ra>
